<compile_context>
chip_gen: v7x
topology: tpu7x:2x2x1
jax: 0.10.0
libtpu: 0.0.40
codegen_flags: <defaults>
</compile_context>

<pallas_src>
import jax
import jax.numpy as jnp
from jax.experimental import pallas as pl
from jax.experimental.pallas import tpu as pltpu

D_IN = 768    # bert hidden size
D_H = 256     # fc1 out
D_OUT = 2     # fc2 out (num classes)
D_PAD = 128   # fc2 output padded to one full lane width (lane-dense store)

NEG_BIG = -1e30  # padded-class bias; exp(NEG_BIG - max) underflows to exactly 0

# Rough per-grid-step pipeline overhead expressed in "rows of HBM traffic"
# (0.35 us at ~1.4 TB/s over ~3.3 KB/row). Used only to pick a batch tile.
_STEP_OVERHEAD_ROWS = 128


def head_kernel(x_ref, w1_ref, b1_ref, w2_ref, b2_ref, o_ref):
    # Cast activations to bf16 in-kernel (VPU, hidden under MXU/DMA) so HBM
    # only ever carries the f32 input once.  Dropout1 = identity in eval mode.
    x = x_ref[...].astype(jnp.bfloat16)                    # (bm, 768)
    # fc1 (bf16 MXU, f32 accumulate) + bias + relu
    h = jnp.dot(x, w1_ref[...], preferred_element_type=jnp.float32)
    h = jnp.maximum(h + b1_ref[...], 0.0)                  # (bm, 256) f32
    # fc2 against lane-padded weights (256 -> 128, real classes in lanes 0:2)
    logits = jnp.dot(h.astype(jnp.bfloat16), w2_ref[...],
                     preferred_element_type=jnp.float32)
    logits = logits + b2_ref[...]                          # (bm, 128) f32
    # log_softmax over lanes; padded lanes carry -1e30 bias (zero weight
    # columns) -> exp() == 0, so lanes 0:2 equal the 2-class log_softmax.
    m = jnp.max(logits, axis=1, keepdims=True)
    s = logits - m
    lse = jnp.log(jnp.sum(jnp.exp(s), axis=1, keepdims=True))
    o_ref[...] = (s - lse).astype(o_ref.dtype)


def prepare_head_params(w1t, b1, w2t, b2):
    """One-time weight prep (call once, reuse across every forward call).

    w1t: (768, 256) fc1 weight pre-transposed; b1: (1, 256) or (256,)
    w2t: (256, 2)   fc2 weight pre-transposed; b2: (1, 2)   or (2,)
    """
    w1_bf16 = w1t.astype(jnp.bfloat16)
    b1_f32 = b1.astype(jnp.float32).reshape(1, D_H)
    w2_pad = jnp.zeros((D_H, D_PAD), jnp.float32).at[:, :D_OUT].set(
        w2t.astype(jnp.float32))
    w2_bf16 = w2_pad.astype(jnp.bfloat16)
    b2_pad = jnp.full((1, D_PAD), NEG_BIG, jnp.float32).at[:, :D_OUT].set(
        b2.astype(jnp.float32).reshape(1, D_OUT))
    return (w1_bf16, b1_f32, w2_bf16, b2_pad)


def _default_bm_max():
    # v7x has 2 TensorCores per chip: keep tiles <= 512 so the "parallel"
    # batch axis can shard across both cores for large batches.
    # v5e / v6e have 1 TC and ample VMEM at bm=1024 (~7 MiB << scoped limit):
    # a bigger tile means fewer grid steps and better DMA efficiency.
    try:
        kind = jax.devices()[0].device_kind.lower()
    except Exception:
        return 512
    if "7" in kind:
        return 512
    return 1024


def _pick_bm(b8, bm_max):
    """Choose the batch tile. b8 is the batch rounded up to a multiple of 8."""
    if b8 <= bm_max:
        return b8  # single tile, zero padding waste
    cands, c = [], 8
    while c <= bm_max:
        cands.append(c)
        c *= 2
    best_bm, best_cost = None, None
    for bm in cands:
        n_tiles = (b8 + bm - 1) // bm
        waste = n_tiles * bm - b8
        cost = n_tiles * _STEP_OVERHEAD_ROWS + waste
        if best_cost is None or cost < best_cost:
            best_bm, best_cost = bm, cost
    return best_bm


def model_arch3_head(cls_hs, prepared_params, *, bm_max=None,
                     out_dtype=jnp.bfloat16):
    """cls_hs: (B, 768) f32. prepared_params: output of prepare_head_params."""
    w1_bf16, b1_f32, w2_bf16, b2_pad = prepared_params
    B = cls_hs.shape[0]
    if bm_max is None:
        bm_max = _default_bm_max()

    # --- batch tiling: adaptive tile, pad B to a multiple of the tile ---
    b8 = ((B + 7) // 8) * 8                 # sublane multiple
    bm = _pick_bm(b8, bm_max)
    b_pad = ((b8 + bm - 1) // bm) * bm
    if b_pad != B:
        cls_hs = jnp.pad(cls_hs, ((0, b_pad - B), (0, 0)))
    grid = (b_pad // bm,)

    out_bytes = jnp.dtype(out_dtype).itemsize
    cost = pl.CostEstimate(
        flops=2 * b_pad * (D_IN * D_H + D_H * D_PAD),
        transcendentals=b_pad * D_PAD,
        bytes_accessed=(b_pad * D_IN * 4            # f32 activations in
                        + D_IN * D_H * 2 + D_H * 4  # fc1 weights / bias
                        + D_H * D_PAD * 2 + D_PAD * 4  # fc2 weights / bias
                        + b_pad * D_PAD * out_bytes),  # output slab
    )

    out_pad = pl.pallas_call(
        head_kernel,
        out_shape=jax.ShapeDtypeStruct((b_pad, D_PAD), out_dtype),
        grid_spec=pltpu.PrefetchScalarGridSpec(
            num_scalar_prefetch=0,
            grid=grid,
            in_specs=[
                pl.BlockSpec((bm, D_IN), lambda i: (i, 0)),
                pl.BlockSpec((D_IN, D_H), lambda i: (0, 0)),
                pl.BlockSpec((1, D_H), lambda i: (0, 0)),
                pl.BlockSpec((D_H, D_PAD), lambda i: (0, 0)),
                pl.BlockSpec((1, D_PAD), lambda i: (0, 0)),
            ],
            out_specs=pl.BlockSpec((bm, D_PAD), lambda i: (i, 0)),
        ),
        compiler_params=pltpu.CompilerParams(
            dimension_semantics=("parallel",)),
        cost_estimate=cost,
    )(cls_hs.astype(jnp.float32), w1_bf16, b1_f32, w2_bf16, b2_pad)

    # Cheap slice back to the real (B, 2) log-probs; fuses into the consumer
    # under jit.
    return out_pad[:B, :D_OUT]


def reference_head(cls_hs, w1t, b1, w2t, b2):
    """Reference with the same bf16-input / f32-accumulate arithmetic."""
    x = cls_hs.astype(jnp.bfloat16)
    h = jnp.dot(x, w1t.astype(jnp.bfloat16),
                preferred_element_type=jnp.float32) + b1
    h = jnp.maximum(h, 0.0)
    logits = jnp.dot(h.astype(jnp.bfloat16), w2t.astype(jnp.bfloat16),
                     preferred_element_type=jnp.float32) + b2
    return jax.nn.log_softmax(logits, axis=1)


if __name__ == "__main__":
    # TODO(synk): the HuggingFace backbone (hugg_model) is not translated;
    # we synthesize its pooled CLS output directly.
    key = jax.random.PRNGKey(0)
    k_x, k_w1, k_b1, k_w2, k_b2 = jax.random.split(key, 5)

    B = 12  # small batch, deliberately not a multiple of 8 to exercise padding
    cls_hs = jax.random.normal(k_x, (B, D_IN), dtype=jnp.float32)

    # Deterministic parameter init (nn.Linear-like uniform scaling).
    w1t = jax.random.uniform(k_w1, (D_IN, D_H), jnp.float32,
                             minval=-1.0, maxval=1.0) / jnp.sqrt(D_IN)
    b1 = jax.random.uniform(k_b1, (1, D_H), jnp.float32,
                            minval=-1.0, maxval=1.0) / jnp.sqrt(D_IN)
    w2t = jax.random.uniform(k_w2, (D_H, D_OUT), jnp.float32,
                             minval=-1.0, maxval=1.0) / jnp.sqrt(D_H)
    b2 = jax.random.uniform(k_b2, (1, D_OUT), jnp.float32,
                            minval=-1.0, maxval=1.0) / jnp.sqrt(D_H)

    # One-time weight prep (hoisted out of the per-call path).
    params = prepare_head_params(w1t, b1, w2t, b2)
    params = jax.tree_util.tree_map(jax.block_until_ready, params)

    out = model_arch3_head(cls_hs, params)
    out = jax.block_until_ready(out)

    ref = reference_head(cls_hs, w1t, b1, w2t, b2)
    assert out.shape == (B, D_OUT)
    # Output is bf16 (per perf review): ~3 significant digits -> loose tol.
    err = jnp.max(jnp.abs(out.astype(jnp.float32) - ref))
    assert jnp.allclose(out.astype(jnp.float32), ref, atol=5e-2, rtol=5e-2), (
        f"max abs err = {err}")

    print("KERNEL_OK")
</pallas_src>

<mosaic_0001>
module attributes {stable_mosaic.version = 11 : i64} {
  func.func @head_kernel(%arg0: i32, %arg1: memref<16x768xf32, #tpu.memory_space<vmem>>, %arg2: memref<768x256xbf16, #tpu.memory_space<vmem>>, %arg3: memref<1x256xf32, #tpu.memory_space<vmem>>, %arg4: memref<256x128xbf16, #tpu.memory_space<vmem>>, %arg5: memref<1x128xf32, #tpu.memory_space<vmem>>, %arg6: memref<16x128xbf16, #tpu.memory_space<vmem>>) attributes {dimension_semantics = [#tpu.dimension_semantics<parallel>], iteration_bounds = array<i64: 1>, scalar_prefetch = 0 : i64, scratch_operands = 0 : i64, tpu.core_type = #tpu.core_type<tc>, window_params = [{transform_indices = @transform_0, window_bounds = array<i64: 16, 768>}, {pipeline_mode = #tpu.pipeline_mode<synchronous>, transform_indices = @transform_1, window_bounds = array<i64: 768, 256>}, {pipeline_mode = #tpu.pipeline_mode<synchronous>, transform_indices = @transform_2, window_bounds = array<i64: 1, 256>}, {pipeline_mode = #tpu.pipeline_mode<synchronous>, transform_indices = @transform_3, window_bounds = array<i64: 256, 128>}, {pipeline_mode = #tpu.pipeline_mode<synchronous>, transform_indices = @transform_4, window_bounds = array<i64: 1, 128>}, {transform_indices = @transform_5, window_bounds = array<i64: 16, 128>}]} {
    %c0 = arith.constant 0 : index
    %c0_0 = arith.constant 0 : index
    %0 = vector.load %arg1[%c0, %c0_0] : memref<16x768xf32, #tpu.memory_space<vmem>>, vector<16x768xf32>
    %1 = arith.truncf %0 : vector<16x768xf32> to vector<16x768xbf16>
    %c0_1 = arith.constant 0 : index
    %c0_2 = arith.constant 0 : index
    %2 = vector.load %arg2[%c0_1, %c0_2] : memref<768x256xbf16, #tpu.memory_space<vmem>>, vector<768x256xbf16>
    %cst = arith.constant dense<0.000000e+00> : vector<16x256xf32>
    %3 = tpu.matmul %1, %2, %cst {dimension_numbers = #tpu.dot_dimension_numbers<[1], [0], [0], [1], [0, 0, 1, 1], [], []>} : vector<16x768xbf16>, vector<768x256xbf16>, vector<16x256xf32> -> vector<16x256xf32>
    %c0_3 = arith.constant 0 : index
    %c0_4 = arith.constant 0 : index
    %4 = vector.load %arg3[%c0_3, %c0_4] : memref<1x256xf32, #tpu.memory_space<vmem>>, vector<1x256xf32>
    %5 = vector.broadcast %4 : vector<1x256xf32> to vector<16x256xf32>
    %6 = arith.addf %3, %5 : vector<16x256xf32>
    %cst_5 = arith.constant 0.000000e+00 : f32
    %7 = vector.broadcast %cst_5 : f32 to vector<16x256xf32>
    %8 = arith.maximumf %6, %7 : vector<16x256xf32>
    %9 = arith.truncf %8 : vector<16x256xf32> to vector<16x256xbf16>
    %c0_6 = arith.constant 0 : index
    %c0_7 = arith.constant 0 : index
    %10 = vector.load %arg4[%c0_6, %c0_7] : memref<256x128xbf16, #tpu.memory_space<vmem>>, vector<256x128xbf16>
    %cst_8 = arith.constant dense<0.000000e+00> : vector<16x128xf32>
    %11 = tpu.matmul %9, %10, %cst_8 {dimension_numbers = #tpu.dot_dimension_numbers<[1], [0], [0], [1], [0, 0, 1, 1], [], []>} : vector<16x256xbf16>, vector<256x128xbf16>, vector<16x128xf32> -> vector<16x128xf32>
    %c0_9 = arith.constant 0 : index
    %c0_10 = arith.constant 0 : index
    %12 = vector.load %arg5[%c0_9, %c0_10] : memref<1x128xf32, #tpu.memory_space<vmem>>, vector<1x128xf32>
    %13 = vector.broadcast %12 : vector<1x128xf32> to vector<16x128xf32>
    %14 = arith.addf %11, %13 : vector<16x128xf32>
    %cst_11 = arith.constant dense<0xFF800000> : vector<16xf32>
    %15 = vector.multi_reduction <maximumf>, %14, %cst_11 [1] : vector<16x128xf32> to vector<16xf32>
    %16 = vector.shape_cast %15 : vector<16xf32> to vector<16x1xf32>
    %17 = vector.broadcast %16 : vector<16x1xf32> to vector<16x128xf32>
    %18 = arith.subf %14, %17 : vector<16x128xf32>
    %19 = math.exp %18 : vector<16x128xf32>
    %cst_12 = arith.constant dense<0.000000e+00> : vector<16xf32>
    %20 = vector.multi_reduction <add>, %19, %cst_12 [1] : vector<16x128xf32> to vector<16xf32>
    %21 = vector.shape_cast %20 : vector<16xf32> to vector<16x1xf32>
    %22 = math.log %21 : vector<16x1xf32>
    %23 = vector.broadcast %22 : vector<16x1xf32> to vector<16x128xf32>
    %24 = arith.subf %18, %23 : vector<16x128xf32>
    %25 = arith.truncf %24 : vector<16x128xf32> to vector<16x128xbf16>
    %c0_13 = arith.constant 0 : index
    %c0_14 = arith.constant 0 : index
    %26 = vector.load %arg6[%c0_13, %c0_14] : memref<16x128xbf16, #tpu.memory_space<vmem>>, vector<16x128xbf16>
    tpu.vector_store %arg6[%c0_13, %c0_14], %25 {strides = array<i32>} : memref<16x128xbf16, #tpu.memory_space<vmem>>, vector<16x128xbf16>,
    return
  }
  func.func @transform_0(%arg0: i32) -> (i32, i32) {
    %c0_i32 = arith.constant 0 : i32
    %c0_i32_0 = arith.constant 0 : i32
    return %arg0, %c0_i32 : i32, i32
  }
  func.func @transform_1(%arg0: i32) -> (i32, i32) {
    %c0_i32 = arith.constant 0 : i32
    %c0_i32_0 = arith.constant 0 : i32
    %c0_i32_1 = arith.constant 0 : i32
    return %c0_i32, %c0_i32_0 : i32, i32
  }
  func.func @transform_2(%arg0: i32) -> (i32, i32) {
    %c0_i32 = arith.constant 0 : i32
    %c0_i32_0 = arith.constant 0 : i32
    %c0_i32_1 = arith.constant 0 : i32
    return %c0_i32, %c0_i32_0 : i32, i32
  }
  func.func @transform_3(%arg0: i32) -> (i32, i32) {
    %c0_i32 = arith.constant 0 : i32
    %c0_i32_0 = arith.constant 0 : i32
    %c0_i32_1 = arith.constant 0 : i32
    return %c0_i32, %c0_i32_0 : i32, i32
  }
  func.func @transform_4(%arg0: i32) -> (i32, i32) {
    %c0_i32 = arith.constant 0 : i32
    %c0_i32_0 = arith.constant 0 : i32
    %c0_i32_1 = arith.constant 0 : i32
    return %c0_i32, %c0_i32_0 : i32, i32
  }
  func.func @transform_5(%arg0: i32) -> (i32, i32) {
    %c0_i32 = arith.constant 0 : i32
    %c0_i32_0 = arith.constant 0 : i32
    return %arg0, %c0_i32 : i32, i32
  }
}

</mosaic_0001>

<bundles_post_ra>
// kernel: tpu_custom_call.1
= control target key start
LH: loop header
LB: loop body
LE: loop exit
PB: predicated region body
PF: predicated region fallthrough
CT: control target
= control target key end

     0   :  { %10 = vsyncpa [#allocation3], 0  ;;  %s1556_s0 = inlined_call_operand.hbm [shape: f32[16,768], index: 0, kind: input, shape index: {}]   ;;  %s1557_s1 = inlined_call_operand.hbm [shape: bf16[768,256], index: 1, kind: input, shape index: {}]   ;;  %s1558_s2 = inlined_call_operand.vmem [shape: f32[1,256], index: 2, kind: input, shape index: {}]   ;;  %s1559_s3 = inlined_call_operand.hbm [shape: bf16[256,128], index: 3, kind: input, shape index: {}]   ;;  %s1560_s4 = inlined_call_operand.vmem [shape: f32[1,128], index: 4, kind: input, shape index: {}]   ;;  %s1561_s5 = inlined_call_operand.hbm [shape: bf16[16,128], index: 5, kind: output, shape index: {}]  }
   0x1   :  { %11 = vsyncpa [#allocation6], 0 }
   0x2   :  { %12 = vsyncpa [#allocation4], 0  ;;  %s1456_s18 = smov [#allocation5]   ;;  %s1362_s22 = scalar_lea.hbm %s1557_s1, 12288 }
   0x3   :  { %s30_s19 = sshll.u32 %s1456_s18, 4  ;;  %p1363_p0 = scmp.ne.s32.totalorder %s1557_s1, %s1362_s22  ;;  %s31_s19 = int_to_ptr.vmem [resolvable:$true] %s30_s19 }
   0x4   :  { %p1366_p1 = scmp.lt.u32.totalorder %s1362_s22, %s1557_s1 }
   0x6   :  { %p1368_p2 = pnand %p1366_p1, %p1363_p0 }
   0x8   :  { %1371 = shalt.err (!%p1368_p2)
}
   0x9   :  { %s1372_s27 = scalar_lea.vmem %s31_s19, 12288  ;;  %p1377_p4 = scmp.lt.s32.totalorder %s31_s19, %s31_s19 }
   0xa   :  { %p1373_p3 = scmp.ne.s32.totalorder %s31_s19, %s1372_s27  ;;  %p1378_p5 = scmp.lt.s32.totalorder %s1372_s27, %s1372_s27 }
   0xc   :  { %p1379_p6 = por %p1378_p5, %p1377_p4 }
   0xe   :  { %p1380_p7 = pnand %p1379_p6, %p1373_p3 }
  0x10   :  { %1383 = shalt.err (!%p1380_p7)
}
  0x11   :  { %s1457_s28 = smov 128   ;;  %s1458_s29 = smov 8  }
  0x12   :  { %36 = dma.hbm_to_vmem [thread:$0]  %s1557_s1, 12288, %s31_s19, [#allocation6], %s1457_s28, %s1457_s28, %s1458_s29  }
  0x13   :  { %s1459_s7 = smov [#allocation2]   ;;  %s1384_s11 = scalar_lea.hbm %s1556_s0, 1536 }
  0x14   :  { %s18_s8 = sshll.u32 %s1459_s7, 4  ;;  %p1385_p8 = scmp.ne.s32.totalorder %s1556_s0, %s1384_s11  ;;  %s19_s8 = int_to_ptr.vmem [resolvable:$true] %s18_s8 }
  0x15   :  { %p1388_p9 = scmp.lt.u32.totalorder %s1384_s11, %s1556_s0 }
  0x17   :  { %p1390_p10 = pnand %p1388_p9, %p1385_p8 }
  0x19   :  { %1393 = shalt.err (!%p1390_p10)
}
  0x1a   :  { %s1394_s16 = scalar_lea.vmem %s19_s8, 1536  ;;  %p1399_p12 = scmp.lt.s32.totalorder %s19_s8, %s19_s8 }
  0x1b   :  { %p1395_p11 = scmp.ne.s32.totalorder %s19_s8, %s1394_s16  ;;  %p1400_p13 = scmp.lt.s32.totalorder %s1394_s16, %s1394_s16 }
  0x1d   :  { %p1401_p0 = por %p1400_p13, %p1399_p12 }
  0x1f   :  { %p1402_p1 = pnand %p1401_p0, %p1395_p11 }
  0x21   :  { %1405 = shalt.err (!%p1402_p1)
}
  0x22   :  { %s1460_s1 = smov 768   ;;  %s1461_s17 = smov 48  }
  0x23   :  { %24 = dma.hbm_to_vmem [thread:$0]  %s1556_s0, 1536, %s19_s8, [#allocation3], %s1460_s1, %s1460_s1, %s1461_s17  }
  0x24   :  { %s1462_s20 = smov [#allocation7]   ;;  %s1406_s24 = scalar_lea.hbm %s1559_s3, 2048 }
  0x25   :  { %s44_s21 = sshll.u32 %s1462_s20, 4  ;;  %p1407_p2 = scmp.ne.s32.totalorder %s1559_s3, %s1406_s24  ;;  %s45_s21 = int_to_ptr.vmem [resolvable:$true] %s44_s21 }
  0x26   :  { %p1410_p3 = scmp.lt.u32.totalorder %s1406_s24, %s1559_s3 }
  0x28   :  { %p1412_p4 = pnand %p1410_p3, %p1407_p2 }
  0x2a   :  { %1415 = shalt.err (!%p1412_p4)
}
  0x2b   :  { %s1416_s29 = scalar_lea.vmem %s45_s21, 2048  ;;  %p1421_p6 = scmp.lt.s32.totalorder %s45_s21, %s45_s21 }
  0x2c   :  { %p1417_p5 = scmp.ne.s32.totalorder %s45_s21, %s1416_s29  ;;  %p1422_p7 = scmp.lt.s32.totalorder %s1416_s29, %s1416_s29 }
  0x2e   :  { %p1423_p8 = por %p1422_p7, %p1421_p6 }
  0x30   :  { %p1424_p9 = pnand %p1423_p8, %p1417_p5 }
  0x32   :  { %1427 = shalt.err (!%p1424_p9)
}
  0x33   :  { %s1463_s0 = smov 64   ;;  %s1464_s30 = smov 4  }
  0x34   :  { %50 = dma.hbm_to_vmem [thread:$0]  %s1559_s3, 2048, %s45_s21, [#allocation6], %s1463_s0, %s1463_s0, %s1464_s30  }
  0x35   :  { %1450 = dma.done.wait [#allocation3], 1536  }
  0x36   :  { %1451 = vsyncadd [#allocation3], 4294965760 }
  0x37   :  { %1452 = dma.done.wait [#allocation6], 14336  }
  0x38   :  { %1453 = vsyncadd [#allocation6], 4294952960  ;;  %v1194_v0 = vld [vmem:[#allocation5 + $0x104] ss:$8 sps:$4 sm:$0xff]   ;;  %v1196_v1 = vld [vmem:[#allocation5 + $0x100] ss:$8 sps:$4 sm:$0xff]  }
  0x39   :  { %712 = vmatprep.subr.bf16.mxu0 %v1194_v0  ;;  %v1197_v2 = vld [vmem:[#allocation5 + $0x114] ss:$8 sps:$4 sm:$0xff]   ;;  %v1199_v3 = vld [vmem:[#allocation5 + $0x110] ss:$8 sps:$4 sm:$0xff]   ;;  %v1200_v4 = vld [vmem:[#allocation5 + $0x124] ss:$8 sps:$4 sm:$0xff]  }
  0x3a   :  { %713 = vmatpush1.bf16.msra.mxu0 %v1196_v1  ;;  %v1202_v5 = vld [vmem:[#allocation5 + $0x120] ss:$8 sps:$4 sm:$0xff]   ;;  %v1203_v6 = vld [vmem:[#allocation5 + $0x134] ss:$8 sps:$4 sm:$0xff]   ;;  %v1205_v7 = vld [vmem:[#allocation5 + $0x130] ss:$8 sps:$4 sm:$0xff]  }
  0x3b   :  { %714 = vmatprep.subr.bf16.mxu0 %v1197_v2  ;;  %v1206_v8 = vld [vmem:[#allocation5 + $0x144] ss:$8 sps:$4 sm:$0xff]   ;;  %v1208_v9 = vld [vmem:[#allocation5 + $0x140] ss:$8 sps:$4 sm:$0xff]   ;;  %v1209_v10 = vld [vmem:[#allocation5 + $0x154] ss:$8 sps:$4 sm:$0xff]  }
  0x3c   :  { %v1211_v11 = vld [vmem:[#allocation5 + $0x150] ss:$8 sps:$4 sm:$0xff]   ;;  %v1212_v12 = vld [vmem:[#allocation5 + $0x164] ss:$8 sps:$4 sm:$0xff]   ;;  %v1241_v14 = vld [vmem:[#allocation5] ss:$8 sps:$4 sm:$0xff]  }
  0x3d   :  { %v1239_v13 = vld [vmem:[#allocation5 + $0x4] ss:$8 sps:$4 sm:$0xff]   ;;  %v1214_v15 = vld [vmem:[#allocation5 + $0x160] ss:$8 sps:$4 sm:$0xff]   ;;  %v1215_v16 = vld [vmem:[#allocation5 + $0x174] ss:$8 sps:$4 sm:$0xff]  }
  0x3e   :  { %715 = vmatpush1.bf16.msra.mxu0 %v1199_v3  ;;  %669 = vmatprep.subr.bf16.mxu1 %v1239_v13  ;;  %v1245_v17 = vld [vmem:[#allocation5 + $0x14] ss:$8 sps:$4 sm:$0xff]   ;;  %v1247_v18 = vld [vmem:[#allocation5 + $0x10] ss:$8 sps:$4 sm:$0xff]   ;;  %v72_v20 = vld [vmem:[#allocation2 + $0x48] sm:$0xff] }
  0x3f   :  { %716 = vmatprep.subr.bf16.mxu0 %v1200_v4  ;;  %670 = vmatpush1.bf16.msra.mxu1 %v1241_v14  ;;  %v66_v19 = vld [vmem:[#allocation2 + $0x18] sm:$0xff]  ;;  %v1251_v23 = vld [vmem:[#allocation5 + $0x24] ss:$8 sps:$4 sm:$0xff]   ;;  %v1253_v24 = vld [vmem:[#allocation5 + $0x20] ss:$8 sps:$4 sm:$0xff]  }
  0x40   :  { %671 = vmatprep.subr.bf16.mxu1 %v1245_v17  ;;  %v78_v21 = vpack.c.bf16 %v72_v20, %v66_v19  ;;  %v1217_v22 = vld [vmem:[#allocation5 + $0x170] ss:$8 sps:$4 sm:$0xff]   ;;  %v1218_v25 = vld [vmem:[#allocation5 + $0x184] ss:$8 sps:$4 sm:$0xff]   ;;  %v1220_v26 = vld [vmem:[#allocation5 + $0x180] ss:$8 sps:$4 sm:$0xff]  }
  0x41   :  { %v1257_v27 = vld [vmem:[#allocation5 + $0x34] ss:$8 sps:$4 sm:$0xff]   ;;  %v1259_v29 = vld [vmem:[#allocation5 + $0x30] ss:$8 sps:$4 sm:$0xff]   ;;  %v1263_v30 = vld [vmem:[#allocation5 + $0x44] ss:$8 sps:$4 sm:$0xff]  }
  0x42   :  { %717 = vmatpush1.bf16.msra.mxu0 %v1202_v5  ;;  %744 = vmatprep.mubr.bf16.mxu0 %v78_v21  ;;  %v1221_v28 = vld [vmem:[#allocation5 + $0x194] ss:$8 sps:$4 sm:$0xff]   ;;  %v1223_v31 = vld [vmem:[#allocation5 + $0x190] ss:$8 sps:$4 sm:$0xff]   ;;  %v1224_v32 = vld [vmem:[#allocation5 + $0x1a4] ss:$8 sps:$4 sm:$0xff]  }
  0x43   :  { %718 = vmatprep.subr.bf16.mxu0 %v1203_v6  ;;  %672 = vmatpush1.bf16.msra.mxu1 %v1247_v18  ;;  %v1265_v33 = vld [vmem:[#allocation5 + $0x40] ss:$8 sps:$4 sm:$0xff]   ;;  %v1269_v34 = vld [vmem:[#allocation5 + $0x54] ss:$8 sps:$4 sm:$0xff]   ;;  %v1271_v37 = vld [vmem:[#allocation5 + $0x50] ss:$8 sps:$4 sm:$0xff]  }
  0x44   :  { %673 = vmatprep.subr.bf16.mxu1 %v1251_v23  ;;  %v1226_v35 = vld [vmem:[#allocation5 + $0x1a0] ss:$8 sps:$4 sm:$0xff]   ;;  %v1227_v36 = vld [vmem:[#allocation5 + $0x1b4] ss:$8 sps:$4 sm:$0xff]   ;;  %v1275_v38 = vld [vmem:[#allocation5 + $0x64] ss:$8 sps:$4 sm:$0xff]  }
  0x45   :  { %v1229_v39 = vld [vmem:[#allocation5 + $0x1b0] ss:$8 sps:$4 sm:$0xff]   ;;  %v1230_v40 = vld [vmem:[#allocation5 + $0x1c4] ss:$8 sps:$4 sm:$0xff]   ;;  %v1277_v41 = vld [vmem:[#allocation5 + $0x60] ss:$8 sps:$4 sm:$0xff]  }
  0x46   :  { %719 = vmatpush1.bf16.msra.mxu0 %v1205_v7  ;;  %v1281_v42 = vld [vmem:[#allocation5 + $0x74] ss:$8 sps:$4 sm:$0xff]   ;;  %v1232_v43 = vld [vmem:[#allocation5 + $0x1c0] ss:$8 sps:$4 sm:$0xff]   ;;  %v1283_v45 = vld [vmem:[#allocation5 + $0x70] ss:$8 sps:$4 sm:$0xff]  }
  0x47   :  { %720 = vmatprep.subr.bf16.mxu0 %v1206_v8  ;;  %674 = vmatpush1.bf16.msra.mxu1 %v1253_v24  ;;  %v1233_v44 = vld [vmem:[#allocation5 + $0x1d4] ss:$8 sps:$4 sm:$0xff]   ;;  %v1287_v46 = vld [vmem:[#allocation5 + $0x84] ss:$8 sps:$4 sm:$0xff]   ;;  %v1235_v47 = vld [vmem:[#allocation5 + $0x1d0] ss:$8 sps:$4 sm:$0xff]  }
  0x48   :  { %675 = vmatprep.subr.bf16.mxu1 %v1257_v27  ;;  %v1236_v48 = vld [vmem:[#allocation5 + $0x1e4] ss:$8 sps:$4 sm:$0xff]   ;;  %v1289_v49 = vld [vmem:[#allocation5 + $0x80] ss:$8 sps:$4 sm:$0xff]   ;;  %v1293_v50 = vld [vmem:[#allocation5 + $0x94] ss:$8 sps:$4 sm:$0xff]  }
  0x49   :  { %v1238_v51 = vld [vmem:[#allocation5 + $0x1e0] ss:$8 sps:$4 sm:$0xff]   ;;  %v1242_v52 = vld [vmem:[#allocation5 + $0x1f4] ss:$8 sps:$4 sm:$0xff]   ;;  %v1295_v53 = vld [vmem:[#allocation5 + $0x90] ss:$8 sps:$4 sm:$0xff]  }
  0x4a   :  { %721 = vmatpush1.bf16.msra.mxu0 %v1208_v9  ;;  %v1299_v54 = vld [vmem:[#allocation5 + $0xa4] ss:$8 sps:$4 sm:$0xff]   ;;  %v1244_v55 = vld [vmem:[#allocation5 + $0x1f0] ss:$8 sps:$4 sm:$0xff]   ;;  %v1301_v59 = vld [vmem:[#allocation5 + $0xa0] ss:$8 sps:$4 sm:$0xff]  }
  0x4b   :  { %722 = vmatprep.subr.bf16.mxu0 %v1209_v10  ;;  %676 = vmatpush1.bf16.msra.mxu1 %v1259_v29  ;;  %v1250_v56 = vld [vmem:[#allocation5 + $0x204] ss:$8 sps:$4 sm:$0xff]   ;;  %v65_v57 = vld [vmem:[#allocation2 + $0x10] sm:$0xff]  ;;  %v1248_v61 = vld [vmem:[#allocation5 + $0x200] ss:$8 sps:$4 sm:$0xff]  }
  0x4c   :  { %677 = vmatprep.subr.bf16.mxu1 %v1263_v30  ;;  %v71_v58 = vld [vmem:[#allocation2 + $0x40] sm:$0xff]  ;;  %v1305_v60 = vld [vmem:[#allocation5 + $0xb4] ss:$8 sps:$4 sm:$0xff]   ;;  %v1307_v0 = vld [vmem:[#allocation5 + $0xb0] ss:$8 sps:$4 sm:$0xff]  }
  0x4d   :  { %v77_v62 = vpack.c.bf16 %v71_v58, %v65_v57  ;;  %v1256_v63 = vld [vmem:[#allocation5 + $0x214] ss:$8 sps:$4 sm:$0xff]   ;;  %v1311_v1 = vld [vmem:[#allocation5 + $0xc4] ss:$8 sps:$4 sm:$0xff]   ;;  %v1254_v5 = vld [vmem:[#allocation5 + $0x210] ss:$8 sps:$4 sm:$0xff]  }
  0x4e   :  { %723 = vmatpush1.bf16.msra.mxu0 %v1211_v11  ;;  %v64_v2 = vld [vmem:[#allocation2 + $0x8] sm:$0xff]  ;;  %v70_v3 = vld [vmem:[#allocation2 + $0x38] sm:$0xff]  ;;  %v69_v23 = vld [vmem:[#allocation2 + $0x30] sm:$0xff] }
  0x4f   :  { %724 = vmatprep.subr.bf16.mxu0 %v1212_v12  ;;  %678 = vmatpush1.bf16.msra.mxu1 %v1265_v33  ;;  %v76_v4 = vpack.c.bf16 %v70_v3, %v64_v2  ;;  %v68_v6 = vld [vmem:[#allocation2 + $0x28] sm:$0xff]  ;;  %v74_v9 = vld [vmem:[#allocation2 + $0x58] sm:$0xff]  ;;  %v1346_v58 = vld [vmem:[#allocation7 + $0x60] sm:$0xff]  }
  0x50   :  { %679 = vmatprep.subr.bf16.mxu1 %v1269_v34  ;;  %v1262_v7 = vld [vmem:[#allocation5 + $0x224] ss:$8 sps:$4 sm:$0xff]   ;;  %v1313_v8 = vld [vmem:[#allocation5 + $0xc0] ss:$8 sps:$4 sm:$0xff]   ;;  %v1317_v10 = vld [vmem:[#allocation5 + $0xd4] ss:$8 sps:$4 sm:$0xff]   ;;  %v80_v11 = vpack.c.bf16 %v74_v9, %v68_v6  ;;  %v179_v6 = vlaneseq }
  0x51   :  { %v1260_v12 = vld [vmem:[#allocation5 + $0x220] ss:$8 sps:$4 sm:$0xff]   ;;  %701 = vmatprep.mubr.bf16.mxu1 %v76_v4  ;;  %v1268_v13 = vld [vmem:[#allocation5 + $0x234] ss:$8 sps:$4 sm:$0xff]   ;;  %v1319_v14 = vld [vmem:[#allocation5 + $0xd0] ss:$8 sps:$4 sm:$0xff]  }
  0x52   :  { %725 = vmatpush1.bf16.msra.mxu0 %v1214_v15  ;;  %v1323_v15 = vld [vmem:[#allocation5 + $0xe4] ss:$8 sps:$4 sm:$0xff]   ;;  %v1325_v18 = vld [vmem:[#allocation5 + $0xe0] ss:$8 sps:$4 sm:$0xff]   ;;  %v1329_v19 = vld [vmem:[#allocation5 + $0xf4] ss:$8 sps:$4 sm:$0xff]  }
  0x53   :  { %726 = vmatprep.subr.bf16.mxu0 %v1215_v16  ;;  %680 = vmatpush1.bf16.msra.mxu1 %v1271_v37  ;;  %v1266_v16 = vld [vmem:[#allocation5 + $0x230] ss:$8 sps:$4 sm:$0xff]   ;;  %v1274_v17 = vld [vmem:[#allocation5 + $0x244] ss:$8 sps:$4 sm:$0xff]   ;;  %v1272_v20 = vld [vmem:[#allocation5 + $0x240] ss:$8 sps:$4 sm:$0xff]  }
  0x54   :  { %681 = vmatprep.subr.bf16.mxu1 %v1275_v38  ;;  %v1331_v21 = vld [vmem:[#allocation5 + $0xf0] ss:$8 sps:$4 sm:$0xff]   ;;  %v1280_v24 = vld [vmem:[#allocation5 + $0x254] ss:$8 sps:$4 sm:$0xff]   ;;  %v1286_v29 = vld [vmem:[#allocation5 + $0x264] ss:$8 sps:$4 sm:$0xff]  }
  0x55   :  { %v1278_v27 = vld [vmem:[#allocation5 + $0x250] ss:$8 sps:$4 sm:$0xff]   ;;  %v1340_v30 = vld [vmem:[#allocation7 + $0x48] sm:$0xff]   ;;  %v1292_v33 = vld [vmem:[#allocation5 + $0x274] ss:$8 sps:$4 sm:$0xff]  }
  0x56   :  { %727 = vmatpush1.bf16.msra.mxu0 %v1217_v22  ;;  %v63_v22 = vld [vmem:[#allocation2] sm:$0xff]  ;;  %v1342_v34 = vld [vmem:[#allocation7 + $0x50] sm:$0xff]   ;;  %v1344_v38 = vld [vmem:[#allocation7 + $0x58] sm:$0xff]  }
  0x57   :  { %728 = vmatprep.subr.bf16.mxu0 %v1218_v25  ;;  %682 = vmatpush1.bf16.msra.mxu1 %v1277_v41  ;;  %v1338_v25 = vld [vmem:[#allocation7 + $0x40] sm:$0xff]   ;;  %v1304_v41 = vld [vmem:[#allocation5 + $0x294] ss:$8 sps:$4 sm:$0xff]  }
  0x58   :  { %683 = vmatprep.subr.bf16.mxu1 %v1281_v42  ;;  %v1298_v37 = vld [vmem:[#allocation5 + $0x284] ss:$8 sps:$4 sm:$0xff]   ;;  %v1302_v42 = vld [vmem:[#allocation5 + $0x290] ss:$8 sps:$4 sm:$0xff]   ;;  %v177_v9 = vld [vmem:[%s1558_s2] sm:$0x3] }
  0x5a   :  { %729 = vmatpush1.bf16.msra.mxu0 %v1220_v26  ;;  %v75_v26 = vpack.c.bf16 %v69_v23, %v63_v22 }
  0x5b   :  { %730 = vmatprep.subr.bf16.mxu0 %v1221_v28  ;;  %684 = vmatpush1.bf16.msra.mxu1 %v1283_v45  ;;  %v1339_v28 = vld [vmem:[#allocation7] sm:$0xff]   ;;  %v1316_v45 = vld [vmem:[#allocation5 + $0x2b4] ss:$8 sps:$4 sm:$0xff]  }
  0x5c   :  { %685 = vmatprep.subr.bf16.mxu1 %v1287_v46  ;;  %v1314_v46 = vld [vmem:[#allocation5 + $0x2b0] ss:$8 sps:$4 sm:$0xff]  }
  0x5e   :  { %731 = vmatpush1.bf16.msra.mxu0 %v1223_v31  ;;  %v1284_v31 = vld [vmem:[#allocation5 + $0x260] ss:$8 sps:$4 sm:$0xff]  }
  0x5f   :  { %732 = vmatprep.subr.bf16.mxu0 %v1224_v32  ;;  %686 = vmatpush1.bf16.msra.mxu1 %v1289_v49  ;;  %v1341_v32 = vld [vmem:[#allocation7 + $0x8] sm:$0xff]   ;;  %v1328_v49 = vld [vmem:[#allocation5 + $0x2d4] ss:$8 sps:$4 sm:$0xff]  }
  0x60   :  { %687 = vmatprep.subr.bf16.mxu1 %v1293_v50  ;;  %v1326_v50 = vld [vmem:[#allocation5 + $0x2d0] ss:$8 sps:$4 sm:$0xff]  }
  0x62   :  { %733 = vmatpush1.bf16.msra.mxu0 %v1226_v35  ;;  %v1290_v35 = vld [vmem:[#allocation5 + $0x270] ss:$8 sps:$4 sm:$0xff]  }
  0x63   :  { %734 = vmatprep.subr.bf16.mxu0 %v1227_v36  ;;  %688 = vmatpush1.bf16.msra.mxu1 %v1295_v53  ;;  %v1343_v36 = vld [vmem:[#allocation7 + $0x10] sm:$0xff]  }
  0x64   :  { %689 = vmatprep.subr.bf16.mxu1 %v1299_v54  ;;  %v1337_v53 = vld [vmem:[#allocation5 + $0x2f4] ss:$8 sps:$4 sm:$0xff]   ;;  %v1335_v54 = vld [vmem:[#allocation5 + $0x2f0] ss:$8 sps:$4 sm:$0xff]  }
  0x66   :  { %735 = vmatpush1.bf16.msra.mxu0 %v1229_v39  ;;  %v1296_v39 = vld [vmem:[#allocation5 + $0x280] ss:$8 sps:$4 sm:$0xff]  }
  0x67   :  { %736 = vmatprep.subr.bf16.mxu0 %v1230_v40  ;;  %690 = vmatpush1.bf16.msra.mxu1 %v1301_v59  ;;  %v1345_v40 = vld [vmem:[#allocation7 + $0x18] sm:$0xff]   ;;  %v1347_v59 = vld [vmem:[#allocation7 + $0x20] sm:$0xff]  }
  0x68   :  { %691 = vmatprep.subr.bf16.mxu1 %v1305_v60  ;;  %v1348_v60 = vld [vmem:[#allocation7 + $0x68] sm:$0xff]  }
  0x6a   :  { %737 = vmatpush1.bf16.msra.mxu0 %v1232_v43  ;;  %v1310_v43 = vld [vmem:[#allocation5 + $0x2a4] ss:$8 sps:$4 sm:$0xff]  }
  0x6b   :  { %738 = vmatprep.subr.bf16.mxu0 %v1233_v44  ;;  %692 = vmatpush1.bf16.msra.mxu1 %v1307_v0  ;;  %v1308_v44 = vld [vmem:[#allocation5 + $0x2a0] ss:$8 sps:$4 sm:$0xff]   ;;  %v1352_v0 = vld [vmem:[#allocation7 + $0x78] sm:$0xff]  }
  0x6c   :  { %693 = vmatprep.subr.bf16.mxu1 %v1311_v1  ;;  %v1353_v1 = vld [vmem:[#allocation7 + $0x38] sm:$0xff]  }
  0x6e   :  { %739 = vmatpush1.bf16.msra.mxu0 %v1235_v47  ;;  %v1322_v47 = vld [vmem:[#allocation5 + $0x2c4] ss:$8 sps:$4 sm:$0xff]  }
  0x6f   :  { %740 = vmatprep.subr.bf16.mxu0 %v1236_v48  ;;  %694 = vmatpush1.bf16.msra.mxu1 %v1313_v8  ;;  %v1320_v48 = vld [vmem:[#allocation5 + $0x2c0] ss:$8 sps:$4 sm:$0xff]  }
  0x70   :  { %695 = vmatprep.subr.bf16.mxu1 %v1317_v10 }
  0x72   :  { %741 = vmatpush1.bf16.msra.mxu0 %v1238_v51  ;;  %v1334_v51 = vld [vmem:[#allocation5 + $0x2e4] ss:$8 sps:$4 sm:$0xff]  }
  0x73   :  { %742 = vmatprep.subr.bf16.mxu0 %v1242_v52  ;;  %696 = vmatpush1.bf16.msra.mxu1 %v1319_v14  ;;  %v1332_v52 = vld [vmem:[#allocation5 + $0x2e0] ss:$8 sps:$4 sm:$0xff]  }
  0x74   :  { %697 = vmatprep.subr.bf16.mxu1 %v1323_v15 }
  0x76   :  { %743 = vmatpush1.bf16.msra.mxu0 %v1244_v55  ;;  %v67_v55 = vld [vmem:[#allocation2 + $0x20] sm:$0xff] }
  0x77   :  { %755 = vmatprep.subr.bf16.mxu0 %v1250_v56  ;;  %698 = vmatpush1.bf16.msra.mxu1 %v1325_v18  ;;  %v73_v56 = vld [vmem:[#allocation2 + $0x50] sm:$0xff] }
  0x78   :  { %699 = vmatprep.subr.bf16.mxu1 %v1329_v19  ;;  %v79_v57 = vpack.c.bf16 %v73_v56, %v67_v55 }
  0x79   :  { %745 = vmatmul.mubr.bf16.vlgmr.msra.gmra.mrb[0].mxu0 %v77_v62  ;;  %v1350_v62 = vld [vmem:[#allocation7 + $0x70] sm:$0xff]  }
  0x7a   :  { %756 = vmatpush1.bf16.msra.mxu0 %v1248_v61  ;;  %787 = vmatprep.mubr.bf16.mxu0 %v80_v11  ;;  %v1349_v61 = vld [vmem:[#allocation7 + $0x28] sm:$0xff]  }
  0x7b   :  { %757 = vmatprep.subr.bf16.mxu0 %v1256_v63  ;;  %700 = vmatpush1.bf16.msra.mxu1 %v1331_v21  ;;  %v1351_v63 = vld [vmem:[#allocation7 + $0x30] sm:$0xff]  }
  0x7c   :  { %1150 = vmatprep.subr.bf16.mxu1 %v1338_v25 }
  0x7e   :  { %758 = vmatpush1.bf16.msra.mxu0 %v1254_v5  ;;  %702 = vmatmul.mubr.bf16.vlgmr.msra.gmra.mrb[0].mxu1 %v75_v26 }
  0x7f   :  { %759 = vmatprep.subr.bf16.mxu0 %v1262_v7  ;;  %1151 = vmatpush3.bf16.msra.mxu1 %v1339_v28  ;;  %v180_v7 = vshrl.u32 %v179_v6, 7 }
  0x80   :  { %1152 = vmatprep.subr.bf16.mxu1 %v1340_v30 }
  0x81   :  { %v181_v8 = vsub.s32 0, %v180_v7  ;;  %v185_v10 = vsub.s32 1, %v180_v7 }
  0x82   :  { %760 = vmatpush1.bf16.msra.mxu0 %v1260_v12 }
  0x83   :  { %761 = vmatprep.subr.bf16.mxu0 %v1268_v13  ;;  %1153 = vmatpush3.bf16.msra.mxu1 %v1341_v32  ;;  %v182_v11 = vrot.slane %v177_v9, %v181_v8  ;;  %v186_v12 = vrot.slane %v177_v9, %v185_v10 }
  0x84   :  { %1154 = vmatprep.subr.bf16.mxu1 %v1342_v34 }
  0x86   :  { %762 = vmatpush1.bf16.msra.mxu0 %v1266_v16 }
  0x87   :  { %763 = vmatprep.subr.bf16.mxu0 %v1274_v17  ;;  %1155 = vmatpush3.bf16.msra.mxu1 %v1343_v36 }
  0x88   :  { %1156 = vmatprep.subr.bf16.mxu1 %v1344_v38 }
  0x8a   :  { %764 = vmatpush1.bf16.msra.mxu0 %v1272_v20 }
  0x8b   :  { %765 = vmatprep.subr.bf16.mxu0 %v1280_v24  ;;  %1157 = vmatpush3.bf16.msra.mxu1 %v1345_v40 }
  0x8c   :  { %1158 = vmatprep.subr.bf16.mxu1 %v1346_v58 }
  0x8e   :  { %766 = vmatpush1.bf16.msra.mxu0 %v1278_v27 }
  0x8f   :  { %767 = vmatprep.subr.bf16.mxu0 %v1286_v29  ;;  %1159 = vmatpush3.bf16.msra.mxu1 %v1347_v59 }
  0x90   :  { %1160 = vmatprep.subr.bf16.mxu1 %v1348_v60 }
  0x92   :  { %768 = vmatpush1.bf16.msra.mxu0 %v1284_v31 }
  0x93   :  { %769 = vmatprep.subr.bf16.mxu0 %v1292_v33  ;;  %1161 = vmatpush3.bf16.msra.mxu1 %v1349_v61  ;;  %v1124_v33 = vld [vmem:[%s1560_s4] ss:$0 sm:$0xff]  ;;  %s1465_s4 = smov [#allocation8]  }
  0x94   :  { %1162 = vmatprep.subr.bf16.mxu1 %v1350_v62  ;;  %s1015_s10 = sshll.u32 %s1465_s4, 4  ;;  %s1016_s10 = int_to_ptr.vmem [resolvable:$true] %s1015_s10 }
  0x95   :  { %s1428_s11 = scalar_lea.vmem %s1016_s10, 128  ;;  %p1433_p11 = scmp.lt.s32.totalorder %s1016_s10, %s1016_s10 }
  0x96   :  { %770 = vmatpush1.bf16.msra.mxu0 %v1290_v35  ;;  %p1429_p10 = scmp.ne.s32.totalorder %s1016_s10, %s1428_s11  ;;  %p1434_p12 = scmp.lt.s32.totalorder %s1428_s11, %s1428_s11 }
  0x97   :  { %771 = vmatprep.subr.bf16.mxu0 %v1298_v37  ;;  %1163 = vmatpush3.bf16.msra.mxu1 %v1351_v63 }
  0x98   :  { %1164 = vmatprep.subr.bf16.mxu1 %v1352_v0  ;;  %p1435_p13 = por %p1434_p12, %p1433_p11 }
  0x9a   :  { %772 = vmatpush1.bf16.msra.mxu0 %v1296_v39  ;;  %p1436_p0 = pnand %p1435_p13, %p1429_p10 }
  0x9b   :  { %773 = vmatprep.subr.bf16.mxu0 %v1304_v41  ;;  %1165 = vmatpush3.bf16.msra.mxu1 %v1353_v1 }
  0x9e   :  { %774 = vmatpush1.bf16.msra.mxu0 %v1302_v42 }
  0x9f   :  { %775 = vmatprep.subr.bf16.mxu0 %v1310_v43 }
  0xa2   :  { %776 = vmatpush1.bf16.msra.mxu0 %v1308_v44 }
  0xa3   :  { %777 = vmatprep.subr.bf16.mxu0 %v1316_v45 }
  0xa6   :  { %778 = vmatpush1.bf16.msra.mxu0 %v1314_v46 }
  0xa7   :  { %779 = vmatprep.subr.bf16.mxu0 %v1322_v47 }
  0xaa   :  { %780 = vmatpush1.bf16.msra.mxu0 %v1320_v48 }
  0xab   :  { %781 = vmatprep.subr.bf16.mxu0 %v1328_v49 }
  0xae   :  { %782 = vmatpush1.bf16.msra.mxu0 %v1326_v50 }
  0xaf   :  { %783 = vmatprep.subr.bf16.mxu0 %v1334_v51 }
  0xb2   :  { %784 = vmatpush1.bf16.msra.mxu0 %v1332_v52 }
  0xb3   :  { %785 = vmatprep.subr.bf16.mxu0 %v1337_v53 }
  0xb6   :  { %786 = vmatpush1.bf16.msra.mxu0 %v1335_v54 }
  0xb9   :  { %788 = vmatmul.mubr.bf16.vlgmr.msra.gmra.mrb[0].mxu0 %v79_v57 }
 0x151   :  { %v703_v2 = vpop.f32.mrb[0].mxu1 }
 0x152   :  { %v705_v3 = vpop.f32.mrb[1].mxu1  ;;  %v704_v13 = vadd.f32 %v703_v2, %v182_v11 }
 0x153   :  { %v707_v4 = vpop.f32.mrb[2].mxu1  ;;  %v706_v14 = vadd.f32 %v705_v3, %v186_v12 }
 0x154   :  { %v709_v5 = vpop.f32.mrb[3].mxu1  ;;  %v708_v16 = vadd.f32 %v707_v4, %v182_v11 }
 0x155   :  { %v710_v19 = vadd.f32 %v709_v5, %v186_v12 }
 0x18c   :  { %v789_v15 = vpop.f32.mrb[0].mxu0 }
 0x18d   :  { %v1173_v17 = vadd.f32 %v789_v15, %v704_v13  ;;  %v791_v18 = vpop.f32.mrb[1].mxu0 }
 0x18e   :  { %v1175_v20 = vadd.f32 %v791_v18, %v706_v14  ;;  %v793_v21 = vpop.f32.mrb[2].mxu0 }
 0x18f   :  { %v1177_v22 = vadd.f32 %v793_v21, %v708_v16  ;;  %v795_v23 = vpop.f32.mrb[3].mxu0  ;;  %v798_v25 = vmax.f32 %v1173_v17, 0.0 }
 0x190   :  { %v1179_v24 = vadd.f32 %v795_v23, %v710_v19  ;;  %v799_v27 = vmax.f32 %v1175_v20, 0.0 }
 0x191   :  { %v800_v26 = vmax.f32 %v1177_v22, 0.0 }
 0x192   :  { %v801_v28 = vmax.f32 %v1179_v24, 0.0 }
 0x193   :  { %v802_v29 = vpack.c.bf16 %v800_v26, %v798_v25 }
 0x194   :  { %v803_v30 = vpack.c.bf16 %v801_v28, %v799_v27 }
 0x196   :  { %971 = vmatprep.mubr.bf16.mxu1 %v803_v30 }
 0x197   :  { %972 = vmatmul.mubr.bf16.vlgmr.msra.gmra.mrb[4].mxu1 %v802_v29 }
 0x26a   :  { %v1166_v31 = vpop.f32.mrb[4].mxu1 }
 0x26b   :  { %v1167_v32 = vpop.f32.mrb[5].mxu1 }
 0x26c   :  { %v1168_v34 = vadd.f32 %v1167_v32, %v1166_v31  ;;  %v1169_v35 = vpop.f32.mrb[6].mxu1 }
 0x26d   :  { %v1170_v36 = vpop.f32.mrb[7].mxu1 }
 0x26e   :  { %v1171_v37 = vadd.f32 %v1170_v36, %v1169_v35  ;;  %v974_v38 = vadd.f32 %v1168_v34, %v1124_v33 }
 0x270   :  { %980 = vmax.xlane.f32.xlu0 %v974_v38  ;;  %v977_v39 = vadd.f32 %v1171_v37, %v1124_v33 }
 0x274   :  { %982 = vmax.xlane.f32.xlu0 %v977_v39 }
 0x2fd   :  { %v981_v40 = vpop.xlane.xlu0 %980 }
 0x2fe   :  { %v984_v41 = vsub.f32 %v974_v38, %v981_v40 }
 0x300   :  { %v986_v42 = vmul.f32 1.442695, %v984_v41 }
 0x301   :  { %v983_v43 = vpop.xlane.xlu0 %982 }
 0x302   :  { %v985_v44 = vsub.f32 %v977_v39, %v983_v43  ;;  %1354 = vpow2.f32 %v986_v42 }
 0x304   :  { %v988_v45 = vmul.f32 1.442695, %v985_v44 }
 0x306   :  { %1356 = vpow2.f32 %v988_v45 }
 0x30c   :  { %v1355_v46 = vpop.eup %1354 }
 0x30d   :  { %990 = vadd.xlane.f32.xlu1 %v1355_v46 }
 0x310   :  { %v1357_v47 = vpop.eup %1356 }
 0x311   :  { %992 = vadd.xlane.f32.xlu1 %v1357_v47 }
 0x39a   :  { %v991_v48 = vpop.xlane.xlu1 %990 }
 0x39b   :  { %1358 = vlog2.f32 %v991_v48 }
 0x39e   :  { %v993_v49 = vpop.xlane.xlu1 %992 }
 0x39f   :  { %1360 = vlog2.f32 %v993_v49 }
 0x3a5   :  { %v1359_v50 = vpop.eup %1358 }
 0x3a6   :  { %v995_v51 = vmul.f32 0.6931472, %v1359_v50 }
 0x3a8   :  { %v998_v54 = vsub.f32 %v984_v41, %v995_v51 }
 0x3a9   :  { %v1361_v52 = vpop.eup %1360 }
 0x3aa   :  { %v997_v53 = vmul.f32 0.6931472, %v1361_v52 }
 0x3ac   :  { %v999_v55 = vsub.f32 %v985_v44, %v997_v53 }
 0x3ae   :  { %v1148_v56 = vpack.c.bf16 %v999_v55, %v998_v54 }
 0x3b0   :  { %1149 = vst [vmem:[#allocation8] sm:$0xff] %v1148_v56  }
 0x3b1   :  { %1439 = shalt.err (!%p1436_p0)
}
 0x3b2   :  { %s1440_s14 = scalar_lea.hbm %s1561_s5, 128 }
 0x3b3   :  { %p1441_p1 = scmp.ne.s32.totalorder %s1561_s5, %s1440_s14  ;;  %p1444_p2 = scmp.lt.u32.totalorder %s1440_s14, %s1561_s5 }
 0x3b5   :  { %p1446_p3 = pnand %p1444_p2, %p1441_p1 }
 0x3b7   :  { %1449 = shalt.err (!%p1446_p3)
}
 0x3b8   :  { %1021 = dma.vmem_to_hbm [thread:$0]  %s1016_s10, 128, %s1561_s5, [#allocation4], %s1463_s0, %s1463_s0, %s1464_s30  }
 0x3b9   :  { %1454 = dma.done.wait [#allocation4], 128  }
 0x3ba   :  { %1455 = vsyncadd [#allocation4], 4294967168 }
 0x3bb   :  { %1025 = vsyncpa [#allocation3], 1 }
 0x3bc   :  { %1026 = vsyncpa [#allocation6], 1 }
 0x3bd   :  { %1027 = vsyncpa [#allocation4], 1 }

</bundles_post_ra>
